<compile_context>
chip_gen: v5e
topology: v5e:2x2
jax: 0.10.0
libtpu: 0.0.40
codegen_flags: <defaults>
</compile_context>

<pallas_src>
import jax
import jax.numpy as jnp
from jax.experimental import pallas as pl
from jax.experimental.pallas import tpu as pltpu

N_EMBED = 128          # n_embed in the PyTorch module
BLOCK_SIZE = 128       # block_size in the PyTorch module (max T)
NEG_BIG = -1e30        # additive mask value (finite; avoids inf-inf NaN risk)


def _head_kernel(x_ref, wqkv_ref, wo_ref, bo_ref, mask_ref, o_ref):
    # x_ref:    (Bb, T, C)  bf16
    # wqkv_ref: (C, 3H)     bf16   (Wq already scaled by C**-0.5)
    # wo_ref:   (H, H)      bf16
    # bo_ref:   (1, H)      f32
    # mask_ref: (T, T)      f32    additive causal bias (0 / -1e30)
    # o_ref:    (Bb, T, H)  f32
    Bb, T, C = x_ref.shape
    H = wo_ref.shape[0]

    # ---- fused QKV projection on a (Bb*T, C) slab -------------------------
    x2d = x_ref[...].reshape(Bb * T, C)                                   # bf16
    qkv = jnp.dot(x2d, wqkv_ref[...],
                  preferred_element_type=jnp.float32)                     # (Bb*T, 3H) f32
    qkv = qkv.reshape(Bb, T, 3 * H)
    k = qkv[:, :, 0:H].astype(jnp.bfloat16)
    q = qkv[:, :, H:2 * H].astype(jnp.bfloat16)    # scale folded into Wq already
    v = qkv[:, :, 2 * H:3 * H].astype(jnp.bfloat16)

    # ---- attention scores: contract head dims directly (no k^T) ----------
    wei = jnp.einsum('bqd,bkd->bqk', q, k,
                     preferred_element_type=jnp.float32)                  # (Bb, T, T) f32
    wei = wei + mask_ref[...]                                             # causal bias

    # ---- softmax (all f32 element-wise math) ------------------------------
    m = jnp.max(wei, axis=-1, keepdims=True)
    p = jnp.exp(wei - m)
    denom = jnp.sum(p, axis=-1, keepdims=True)
    p = p * pl.reciprocal(denom, approx=True)

    # ---- weighted values + output projection ------------------------------
    out = jnp.einsum('bqk,bkd->bqd', p.astype(jnp.bfloat16), v,
                     preferred_element_type=jnp.float32)                  # (Bb, T, H) f32
    out2d = out.reshape(Bb * T, H).astype(jnp.bfloat16)
    out2d = jnp.dot(out2d, wo_ref[...],
                    preferred_element_type=jnp.float32) + bo_ref[...]     # (Bb*T, H) f32

    # out_drop: nn.Dropout in eval mode is the identity (inference semantics).
    o_ref[...] = out2d.reshape(Bb, T, H).astype(o_ref.dtype)


def _pick_block_b(B, cap=16):
    """Largest batch block that keeps >= 2 grid steps (v7x megacore) and divides B."""
    best = 1
    for bb in range(1, min(B, cap) + 1):
        if B % bb == 0 and (B == 1 or B // bb >= 2):
            best = bb
    return best


def head_forward(x, wk, wq, wv, wo, bo, *, block_b=None):
    """x: (B, T, C) float32. Weights pre-transposed to (in, out). Returns (B, T, H) f32."""
    B, T, C = x.shape
    H = wk.shape[1]
    assert C == N_EMBED
    assert T <= BLOCK_SIZE

    if block_b is None:
        block_b = _pick_block_b(B)
    assert B % block_b == 0
    grid_b = B // block_b

    # Fold the C**-0.5 attention scale into Wq, fuse QKV weights, cast MXU inputs to bf16.
    scale = jnp.float32(C) ** -0.5
    wqkv = jnp.concatenate([wk, wq * scale, wv], axis=1).astype(jnp.bfloat16)  # (C, 3H)
    x_bf = x.astype(jnp.bfloat16)
    wo_bf = wo.astype(jnp.bfloat16)
    bo2 = bo.reshape(1, H).astype(jnp.float32)

    # Precomputed additive causal bias (resident in VMEM across the grid).
    tril = jnp.tril(jnp.ones((T, T), dtype=bool))
    mask_bias = jnp.where(tril, 0.0, NEG_BIG).astype(jnp.float32)

    return pl.pallas_call(
        _head_kernel,
        out_shape=jax.ShapeDtypeStruct((B, T, H), x.dtype),
        grid_spec=pltpu.PrefetchScalarGridSpec(
            num_scalar_prefetch=0,
            grid=(grid_b,),
            in_specs=[
                pl.BlockSpec((block_b, T, C), lambda b: (b, 0, 0)),   # x (batch block)
                pl.BlockSpec((C, 3 * H), lambda b: (0, 0)),           # fused Wqkv
                pl.BlockSpec((H, H), lambda b: (0, 0)),               # Wo
                pl.BlockSpec((1, H), lambda b: (0, 0)),               # bo
                pl.BlockSpec((T, T), lambda b: (0, 0)),               # causal bias
            ],
            out_specs=pl.BlockSpec((block_b, T, H), lambda b: (b, 0, 0)),
        ),
        compiler_params=pltpu.CompilerParams(
            dimension_semantics=("parallel",),
        ),
    )(x_bf, wqkv, wo_bf, bo2, mask_bias)


def _reference(x, wk, wq, wv, wo, bo):
    """Pure f32 JAX reference matching the PyTorch module."""
    B, T, C = x.shape
    k = x @ wk
    q = x @ wq
    v = x @ wv
    wei = (q @ jnp.swapaxes(k, -2, -1)) * (C ** -0.5)
    mask = jnp.tril(jnp.ones((T, T), dtype=bool))
    wei = jnp.where(mask, wei, -jnp.inf)
    wei = jax.nn.softmax(wei, axis=-1)
    out = wei @ v
    return out @ wo + bo


if __name__ == "__main__":
    key = jax.random.PRNGKey(0)
    B, T, C, H = 2, 8, N_EMBED, 32   # head_size = 32

    k0, k1, k2, k3, k4, k5 = jax.random.split(key, 6)
    x = jax.random.normal(k0, (B, T, C), dtype=jnp.float32)

    # Deterministic parameter init (uniform, same scale as PyTorch Linear default).
    bound_in = 1.0 / (C ** 0.5)
    bound_h = 1.0 / (H ** 0.5)
    wk = jax.random.uniform(k1, (C, H), jnp.float32, -bound_in, bound_in)
    wq = jax.random.uniform(k2, (C, H), jnp.float32, -bound_in, bound_in)
    wv = jax.random.uniform(k3, (C, H), jnp.float32, -bound_in, bound_in)
    wo = jax.random.uniform(k4, (H, H), jnp.float32, -bound_h, bound_h)
    bo = jax.random.uniform(k5, (H,), jnp.float32, -bound_h, bound_h)

    out = head_forward(x, wk, wq, wv, wo, bo)
    out = jax.block_until_ready(out)

    ref = _reference(x, wk, wq, wv, wo, bo)
    assert out.shape == (B, T, H)
    # Tolerance loosened vs. the pure-f32 version because MXU inputs are bf16
    # (f32 accumulation); error stays well below a few percent.
    assert jnp.allclose(out, ref, atol=5e-2, rtol=5e-2), float(jnp.max(jnp.abs(out - ref)))

    print("KERNEL_OK")
</pallas_src>

<mosaic_0001>
module attributes {stable_mosaic.version = 11 : i64} {
  func.func @_head_kernel(%arg0: i32, %arg1: memref<1x8x128xbf16, #tpu.memory_space<vmem>>, %arg2: memref<128x96xbf16, #tpu.memory_space<vmem>>, %arg3: memref<32x32xbf16, #tpu.memory_space<vmem>>, %arg4: memref<1x32xf32, #tpu.memory_space<vmem>>, %arg5: memref<8x8xf32, #tpu.memory_space<vmem>>, %arg6: memref<1x8x32xf32, #tpu.memory_space<vmem>>) attributes {dimension_semantics = [#tpu.dimension_semantics<parallel>], iteration_bounds = array<i64: 2>, scalar_prefetch = 0 : i64, scratch_operands = 0 : i64, tpu.core_type = #tpu.core_type<tc>, window_params = [{transform_indices = @transform_0, window_bounds = array<i64: 1, 8, 128>}, {pipeline_mode = #tpu.pipeline_mode<synchronous>, transform_indices = @transform_1, window_bounds = array<i64: 128, 96>}, {pipeline_mode = #tpu.pipeline_mode<synchronous>, transform_indices = @transform_2, window_bounds = array<i64: 32, 32>}, {pipeline_mode = #tpu.pipeline_mode<synchronous>, transform_indices = @transform_3, window_bounds = array<i64: 1, 32>}, {pipeline_mode = #tpu.pipeline_mode<synchronous>, transform_indices = @transform_4, window_bounds = array<i64: 8, 8>}, {transform_indices = @transform_5, window_bounds = array<i64: 1, 8, 32>}]} {
    %c0 = arith.constant 0 : index
    %c0_0 = arith.constant 0 : index
    %c0_1 = arith.constant 0 : index
    %0 = vector.load %arg1[%c0, %c0_0, %c0_1] : memref<1x8x128xbf16, #tpu.memory_space<vmem>>, vector<1x8x128xbf16>
    %1 = vector.shape_cast %0 : vector<1x8x128xbf16> to vector<8x128xbf16>
    %c0_2 = arith.constant 0 : index
    %c0_3 = arith.constant 0 : index
    %2 = vector.load %arg2[%c0_2, %c0_3] : memref<128x96xbf16, #tpu.memory_space<vmem>>, vector<128x96xbf16>
    %cst = arith.constant dense<0.000000e+00> : vector<8x96xf32>
    %3 = tpu.matmul %1, %2, %cst {dimension_numbers = #tpu.dot_dimension_numbers<[1], [0], [0], [1], [0, 0, 1, 1], [], []>} : vector<8x128xbf16>, vector<128x96xbf16>, vector<8x96xf32> -> vector<8x96xf32>
    %4 = vector.shape_cast %3 : vector<8x96xf32> to vector<1x8x96xf32>
    %5 = vector.extract_strided_slice %4 {offsets = [0, 0, 0], sizes = [1, 8, 32], strides = [1, 1, 1]} : vector<1x8x96xf32> to vector<1x8x32xf32>
    %6 = arith.truncf %5 : vector<1x8x32xf32> to vector<1x8x32xbf16>
    %7 = vector.extract_strided_slice %4 {offsets = [0, 0, 32], sizes = [1, 8, 32], strides = [1, 1, 1]} : vector<1x8x96xf32> to vector<1x8x32xf32>
    %8 = arith.truncf %7 : vector<1x8x32xf32> to vector<1x8x32xbf16>
    %9 = vector.extract_strided_slice %4 {offsets = [0, 0, 64], sizes = [1, 8, 32], strides = [1, 1, 1]} : vector<1x8x96xf32> to vector<1x8x32xf32>
    %10 = arith.truncf %9 : vector<1x8x32xf32> to vector<1x8x32xbf16>
    "tpu.trace_start"() <{level = 10 : i32, message = "bqd,bkd->bqk"}> : () -> ()
    %cst_4 = arith.constant dense<0.000000e+00> : vector<1x8x8xf32>
    %11 = tpu.matmul %8, %6, %cst_4 {dimension_numbers = #tpu.dot_dimension_numbers<[2], [2], [1], [1], [0, 0, 0, 1, 1, 1], [0], [0]>} : vector<1x8x32xbf16>, vector<1x8x32xbf16>, vector<1x8x8xf32> -> vector<1x8x8xf32>
    "tpu.trace_stop"() : () -> ()
    %c0_5 = arith.constant 0 : index
    %c0_6 = arith.constant 0 : index
    %12 = vector.load %arg5[%c0_5, %c0_6] : memref<8x8xf32, #tpu.memory_space<vmem>>, vector<8x8xf32>
    %13 = vector.shape_cast %12 : vector<8x8xf32> to vector<1x8x8xf32>
    %14 = arith.addf %11, %13 : vector<1x8x8xf32>
    %cst_7 = arith.constant dense<0xFF800000> : vector<1x8xf32>
    %15 = vector.multi_reduction <maximumf>, %14, %cst_7 [2] : vector<1x8x8xf32> to vector<1x8xf32>
    %16 = vector.shape_cast %15 : vector<1x8xf32> to vector<1x8x1xf32>
    %17 = vector.broadcast %16 : vector<1x8x1xf32> to vector<1x8x8xf32>
    %18 = arith.subf %14, %17 : vector<1x8x8xf32>
    %19 = math.exp %18 : vector<1x8x8xf32>
    %cst_8 = arith.constant dense<0.000000e+00> : vector<1x8xf32>
    %20 = vector.multi_reduction <add>, %19, %cst_8 [2] : vector<1x8x8xf32> to vector<1x8xf32>
    %21 = vector.shape_cast %20 : vector<1x8xf32> to vector<1x8x1xf32>
    %22 = tpu.reciprocal %21 {approx = true} : vector<1x8x1xf32> -> vector<1x8x1xf32>
    %23 = vector.broadcast %22 : vector<1x8x1xf32> to vector<1x8x8xf32>
    %24 = arith.mulf %19, %23 : vector<1x8x8xf32>
    %25 = arith.truncf %24 : vector<1x8x8xf32> to vector<1x8x8xbf16>
    "tpu.trace_start"() <{level = 10 : i32, message = "bqk,bkd->bqd"}> : () -> ()
    %cst_9 = arith.constant dense<0.000000e+00> : vector<1x8x32xf32>
    %26 = tpu.matmul %25, %10, %cst_9 {dimension_numbers = #tpu.dot_dimension_numbers<[2], [1], [1], [2], [0, 0, 0, 1, 1, 2], [0], [0]>} : vector<1x8x8xbf16>, vector<1x8x32xbf16>, vector<1x8x32xf32> -> vector<1x8x32xf32>
    "tpu.trace_stop"() : () -> ()
    %27 = vector.shape_cast %26 : vector<1x8x32xf32> to vector<8x32xf32>
    %28 = arith.truncf %27 : vector<8x32xf32> to vector<8x32xbf16>
    %c0_10 = arith.constant 0 : index
    %c0_11 = arith.constant 0 : index
    %29 = vector.load %arg3[%c0_10, %c0_11] : memref<32x32xbf16, #tpu.memory_space<vmem>>, vector<32x32xbf16>
    %cst_12 = arith.constant dense<0.000000e+00> : vector<8x32xf32>
    %30 = tpu.matmul %28, %29, %cst_12 {dimension_numbers = #tpu.dot_dimension_numbers<[1], [0], [0], [1], [0, 0, 1, 1], [], []>} : vector<8x32xbf16>, vector<32x32xbf16>, vector<8x32xf32> -> vector<8x32xf32>
    %c0_13 = arith.constant 0 : index
    %c0_14 = arith.constant 0 : index
    %31 = vector.load %arg4[%c0_13, %c0_14] : memref<1x32xf32, #tpu.memory_space<vmem>>, vector<1x32xf32>
    %32 = vector.broadcast %31 : vector<1x32xf32> to vector<8x32xf32>
    %33 = arith.addf %30, %32 : vector<8x32xf32>
    %34 = vector.shape_cast %33 : vector<8x32xf32> to vector<1x8x32xf32>
    %c0_15 = arith.constant 0 : index
    %c0_16 = arith.constant 0 : index
    %c0_17 = arith.constant 0 : index
    %35 = vector.load %arg6[%c0_15, %c0_16, %c0_17] : memref<1x8x32xf32, #tpu.memory_space<vmem>>, vector<1x8x32xf32>
    tpu.vector_store %arg6[%c0_15, %c0_16, %c0_17], %34 {strides = array<i32>} : memref<1x8x32xf32, #tpu.memory_space<vmem>>, vector<1x8x32xf32>,
    return
  }
  func.func @transform_0(%arg0: i32) -> (i32, i32, i32) {
    %c0_i32 = arith.constant 0 : i32
    %c0_i32_0 = arith.constant 0 : i32
    %c0_i32_1 = arith.constant 0 : i32
    return %arg0, %c0_i32, %c0_i32_0 : i32, i32, i32
  }
  func.func @transform_1(%arg0: i32) -> (i32, i32) {
    %c0_i32 = arith.constant 0 : i32
    %c0_i32_0 = arith.constant 0 : i32
    %c0_i32_1 = arith.constant 0 : i32
    return %c0_i32, %c0_i32_0 : i32, i32
  }
  func.func @transform_2(%arg0: i32) -> (i32, i32) {
    %c0_i32 = arith.constant 0 : i32
    %c0_i32_0 = arith.constant 0 : i32
    %c0_i32_1 = arith.constant 0 : i32
    return %c0_i32, %c0_i32_0 : i32, i32
  }
  func.func @transform_3(%arg0: i32) -> (i32, i32) {
    %c0_i32 = arith.constant 0 : i32
    %c0_i32_0 = arith.constant 0 : i32
    %c0_i32_1 = arith.constant 0 : i32
    return %c0_i32, %c0_i32_0 : i32, i32
  }
  func.func @transform_4(%arg0: i32) -> (i32, i32) {
    %c0_i32 = arith.constant 0 : i32
    %c0_i32_0 = arith.constant 0 : i32
    %c0_i32_1 = arith.constant 0 : i32
    return %c0_i32, %c0_i32_0 : i32, i32
  }
  func.func @transform_5(%arg0: i32) -> (i32, i32, i32) {
    %c0_i32 = arith.constant 0 : i32
    %c0_i32_0 = arith.constant 0 : i32
    %c0_i32_1 = arith.constant 0 : i32
    return %arg0, %c0_i32, %c0_i32_0 : i32, i32, i32
  }
}

</mosaic_0001>

<bundles_post_ra>
// kernel: tpu_custom_call.1
= control target key start
LH: loop header
LB: loop body
LE: loop exit
PB: predicated region body
PF: predicated region fallthrough
CT: control target
= control target key end

     0   :  { %10 = vsyncpa [#allocation3], 0  ;;  %s807_s0 = inlined_call_operand.vmem [shape: bf16[2,8,128], index: 0, kind: input, shape index: {}]   ;;  %s808_s1 = inlined_call_operand.vmem [shape: bf16[128,96], index: 1, kind: input, shape index: {}]   ;;  %s809_s2 = inlined_call_operand.vmem [shape: bf16[32,32], index: 2, kind: input, shape index: {}]   ;;  %s810_s3 = inlined_call_operand.vmem [shape: f32[1,32], index: 3, kind: input, shape index: {}]   ;;  %s811_s4 = inlined_call_operand.vmem [shape: f32[8,8], index: 4, kind: input, shape index: {}]   ;;  %s812_s5 = inlined_call_operand.hbm [shape: f32[2,8,32], index: 5, kind: output, shape index: {}]  }
   0x1   :  { %12 = vsyncpa [#allocation3 + $0x1], 0  ;;  %s679_s18 = smov 0   ;;  %s681_s19 = smov 0  }
   0x2   :  { %s683_s20 = smov 0   ;;  %s685_s21 = smov 0  }
   0x3 LB: > { %s700_s22 = sadd.s32 4294967295, %s645_s21   ;;  %s474_s23 = sadd.s32 4294967294, %s645_s21   ;;  %s645_s21 = sphi %s685_s21, %s818_s21   ;;  %s641_s20 = sphi %s683_s20, %s817_s20   ;;  %s637_s19 = sphi %s681_s19, %s816_s19   ;;  %s633_s18 = sphi %s679_s18, %s815_s18  }
   0x4   : > { %s704_s24 = sadd.s32 1, %s645_s21   ;;  %s135_s25 = sadd.s32 1, %s641_s20 }
   0x5   : > { %s132_s26 = ssub.s32 %s645_s21, %s704_s24  ;;  %p145_p0 = scmp.ne.s32.totalorder %s641_s20, %s637_s19 }
   0x6   : > { %p133_p1 = scmp.eq.s32.totalorder %s132_s26, 0  ;;  %p146_p2 = scmp.eq.s32.totalorder %s700_s22, 1 }
   0x7   : > { %p151_p3 = scmp.ne.s32.totalorder %s637_s19, %s633_s18  ;;  %p152_p4 = scmp.eq.s32.totalorder %s474_s23, 1 }
   0x8   : > { %s715_s27 = scalar_select %p133_p1, %s641_s20, %s135_s25  }
   0x9   : > { %p717_p5 = por %p146_p2, %p145_p0  ;;  %p721_p6 = por %p152_p4, %p151_p3 }
   0xa   : > { %p477_p7 = scmp.ge.s32.totalorder %s645_s21, 1  ;;  %p189_p8 = scmp.lt.s32.totalorder %s645_s21, 3 }
   0xc   : > { %p190_p9 = pnand %p477_p7, %p189_p8 }
   0xd   : > { %p216_p10 = scmp.lt.s32.totalorder (!%p190_p9), %s700_s22, 1  ;;  %s647_s10 = smov (!%p190_p9), 96  }
   0xe   : > { %193 = sbr.rel (%p190_p9) target bundleno = 973 (0x3cd), region = 40  ;;  %s648_s13 = smov (!%p190_p9), 64  }
   0xf   : > { %s213_s23 = sand.u32 (!%p190_p9), 1, %s637_s19   ;;  %s524_s25 = sshll.u32 (!%p190_p9), %s700_s22, 3 }
  0x10   : > { %s410_s7 = scalar_lea.hbm (!%p190_p9), %s812_s5, %s524_s25 }
  0x11   : > { %s414_s12 = sshll.u32 (!%p190_p9), %s410_s7, 4  ;;  %s415_s12 = int_to_ptr.hbm [resolvable:$true] %s414_s12 }
  0x13   : > { %v534_v0 = vld [vmem:[%s808_s1 + $0x38] sm:$0xff]  ;;  %v533_v1 = vld [vmem:[%s808_s1 + $0x30] sm:$0xff]  ;;  %v532_v2 = vld [vmem:[%s808_s1 + $0x28] sm:$0xff]  ;;  %s217_s17 = scalar_select %p216_p10, %s700_s22, 1  ;;  %vm306_vm0 = vcmask 261120   ;;  %vm326_vm1 = vcmask 64512  }
  0x14   : > { %286 = vmatpush.bf16.msra.mxu0 %v534_v0  ;;  %v531_v3 = vld [vmem:[%s808_s1 + $0x20] sm:$0xff]  ;;  %v530_v4 = vld [vmem:[%s808_s1 + $0x18] sm:$0xff]  ;;  %v529_v5 = vld [vmem:[%s808_s1 + $0x10] sm:$0xff]  ;;  %vm344_vm2 = vcmask 1043456   ;;  %s400_s22 = scalar_lea.sflag [#allocation3], %s213_s23 }
  0x15   : > { %v528_v6 = vld [vmem:[%s808_s1 + $0x8] sm:$0xff]  ;;  %s479_s26 = sshll.u32 %s217_s17, 2  ;;  %v527_v7 = vld [vmem:[%s808_s1] sm:$0xff]  ;;  %s603_s17 = scalar_lea.hbm %s812_s5, 16 }
  0x16   : > { %s219_s9 = scalar_lea.vmem %s807_s0, %s479_s26  ;;  %v300_v16 = vld [vmem:[%s811_s4] sm:$0xff]  ;;  %v536_v26 = vld [vmem:[%s809_s2 + $0x8] sm:$0xff]  ;;  %s478_s26 = sshll.u32 %s213_s23, 3 }
  0x17   : > { %v221_v8 = vld [vmem:[%s219_s9] sm:$0xf]  ;;  %391 = vmatpush.bf16.msra.mxu3 %v536_v26 }
  0x18   : > { %287 = vmatpush.bf16.msra.mxu0 %v533_v1  ;;  %v535_v33 = vld [vmem:[%s809_s2] sm:$0xff] }
  0x19   : > { %v578_v37 = vld [vmem:[%s810_s3] ss:$0 sm:$0xff] }
  0x1b   : > { %392 = vmatpush.bf16.msra.mxu3 %v535_v33 }
  0x1c   : > { %288 = vmatpush.bf16.msra.mxu0 %v532_v2 }
  0x20   : > { %289 = vmatpush.bf16.msra.mxu0 %v531_v3 }
  0x24   : > { %290 = vmatpush.bf16.msra.mxu0 %v530_v4 }
  0x28   : > { %291 = vmatpush.bf16.msra.mxu0 %v529_v5 }
  0x2c   : > { %292 = vmatpush.bf16.msra.mxu0 %v528_v6 }
  0x30   : > { %293 = vmatpush.bf16.msra.mxu0 %v527_v7 }
  0x33   : > { %294 = vmatmul.bf16.vlgmr.msra.gmra.mxu0 %v221_v8 }
  0xb0   : > { %v295_v9 = vpop.f32.mrf.mxu0 }
  0xb1   : > { %v299_v10 = vpack.c.bf16 %v295_v9, %v295_v9 }
  0xb3   : > { %v311_v11 = vsel %vm306_vm0, %v299_v10, 0  ;;  %v302_v12 = vunpack.c.l.b16 %v299_v10 }
  0xb4   : > { %320 = vmatpush.bf16.xpose.msra.mxu1 %v311_v11 }
  0xb5   : > { %v303_v13 = vpack.c.b16 %v302_v12, %v302_v12 }
  0xb7   : > { %304 = vrot.lane.b32.xlu0 %v303_v13, %s647_s10  ;;  %s215_s10 = scalar_lea.vmem [#allocation2], %s478_s26 }
  0xb8   : > { %v297_v14 = vpop.f32.mrf.mxu0  ;;  %s412_s11 = sshll.u32 %s215_s10, 4  ;;  %s413_s11 = int_to_ptr.vmem [resolvable:$true] %s412_s11 }
 0x129   : > { %v305_v15 = vpop.permute.xlu0 %304 }
 0x12a   : > { %512 = vmatmul.msk.bf16.vlgmr.msra.gmra.mxu1 %vm306_vm0, %v305_v15 }
 0x1a7   : > { %v322_v17 = vpop.f32.mrf.mxu1 }
 0x1a8   : > { %v323_v18 = vadd.f32 %v322_v17, %v300_v16 }
 0x1aa   : > { %v327_v19 = vsel %vm326_vm1, %v323_v18, -inf }
 0x1ab   : > { %328 = vmax.xlane.f32.xlu0 %v327_v19 }
 0x1af   : > { %v324_v20 = vpop.f32.mrf.mxu1 }
 0x21e   : > { %v329_v21 = vpop.xlane.xlu0 %328 }
 0x21f   : > { %v330_v22 = vsub.f32 %v323_v18, %v329_v21 }
 0x221   : > { %v331_v23 = vmul.f32 1.442695, %v330_v22 }
 0x223   : > { %579 = vpow2.f32 %v331_v23 }
 0x229   : > { %v580_v24 = vpop.eup %579 }
 0x22a   : > { %v333_v25 = vsel %vm326_vm1, %v580_v24, 0.0 }
 0x22b   : > { %334 = vadd.xlane.f32.xlu1 %v333_v25 }
 0x244   : > { %339 = vrot.lane.b32.xlu1 %v303_v13, %s648_s13  ;;  %s597_s13 = sshra.s32 %s415_s12, 4  ;;  %s598_s13 = int_to_ptr.hbm [resolvable:$true] %s597_s13 }
 0x245   : > { %s599_s14 = scalar_lea.hbm %s598_s13, 8  ;;  %p604_p0 = scmp.lt.s32.totalorder %s598_s13, %s812_s5 }
 0x246   : > { %p600_p11 = scmp.ne.s32.totalorder %s598_s13, %s599_s14  ;;  %p605_p1 = scmp.lt.s32.totalorder %s603_s17, %s599_s14 }
 0x248   : > { %p601_p12 = pnand %p600_p11, %p717_p5  ;;  %p606_p2 = por %p605_p1, %p604_p0 }
 0x24a   : > { %p602_p13 = pneg %p601_p12 }
 0x24c   : > { %p607_p3 = pnand %p606_p2, %p602_p13 }
 0x29e   : > { %v335_v27 = vpop.xlane.xlu1 %334 }
 0x29f   : > { %581 = vrcp.f32 %v335_v27 }
 0x2a5   : > { %v582_v28 = vpop.eup %581 }
 0x2a6   : > { %v337_v29 = vmul.f32 %v582_v28, %v580_v24 }
 0x2a8   : > { %v338_v32 = vpack.c.bf16 %v337_v29, %v337_v29 }
 0x2b6   : > { %v340_v30 = vpop.permute.xlu1 %339 }
 0x2b7   : > { %v346_v31 = vsel %vm344_vm2, %v340_v30, 0 }
 0x2b8   : > { %355 = vmatpush.bf16.msra.mxu2 %v346_v31 }
 0x2bb   : > { %513 = vmatmul.msk.bf16.vlgmr.msra.gmra.mxu2 %vm326_vm1, %v338_v32 }
 0x33e   : > { %v357_v34 = vpop.f32.mrf.mxu2 }
 0x33f   : > { %v361_v35 = vpack.c.bf16 %v357_v34, %v357_v34 }
 0x341   : > { %522 = vmatmul.msk.bf16.vlgmr.msra.gmra.mxu3 %vm306_vm0, %v361_v35 }
 0x346   : > { %v359_v36 = vpop.f32.mrf.mxu2 }
 0x3c4   : > { %v394_v38 = vpop.f32.mrf.mxu3 }
 0x3c5   : > { %v395_v39 = vadd.f32 %v578_v37, %v394_v38 }
 0x3c7   : > { %398 = vst.msk [vmem:[%s215_s10] sm:$0xff] %vm306_vm0, %v395_v39 }
 0x3c8   : > { %610 = shalt.err (!%p607_p3)
}
 0x3c9   : > { %537 = dma.vmem_to_hbm [thread:$0]  (%p717_p5), %s413_s11, 128, %s415_s12, %s400_s22  }
 0x3cc   : > { %v396_v40 = vpop.f32.mrf.mxu3 }
 0x3cd PF: > { %p543_p4 = scmp.ge.s32.totalorder %s645_s21, 2  ;;  %s426_s23 = sand.u32 1, %s633_s18  }
 0x3ce   : > { %s427_s30 = scalar_lea.sflag [#allocation3], %s426_s23 }
 0x3cf   : > { %p540_p7 = pnand %p543_p4, %p721_p6 }
 0x3d1   : > { %p541_p8 = pneg %p540_p7 }
 0x3d3   : > { %628 = dma.done.wait (%p541_p8), %s427_s30, 128  }
 0x3d4   : > { %630 = vsyncadd (%p541_p8), %s427_s30, 4294967168  ;;  %p15_p9 = scmp.ge.s32.totalorder %s704_s24, 4   ;;  %s815_s18 = smov %s637_s19 }
 0x3d5   : > { %s816_s19 = smov %s641_s20  ;;  %s817_s20 = smov %s715_s27 }
 0x3d6   : > { %s818_s21 = smov %s704_s24  ;;  %17 = sbr.rel (!%p15_p9) target bundleno = 3 (0x3), region = 75 }
 0x3db   :  { %433 = vsyncpa [#allocation3], 1 }
 0x3dc   :  { %435 = vsyncpa [#allocation3 + $0x1], 1 }

</bundles_post_ra>
